<compile_context>
chip_gen: v6e
topology: v6e:2x2x1
jax: 0.10.0
libtpu: 0.0.40
codegen_flags: <defaults>
</compile_context>

<pallas_src>
from functools import partial

import jax
import jax.numpy as jnp
from jax import lax
from jax.experimental import pallas as pl
from jax.experimental.pallas import tpu as pltpu


_VMEM_LIMIT = 32 * 1024 * 1024     # explicit scoped-VMEM limit (safe on v5e/v6e/v7x)
_BLOCK_TARGET = 4 * 1024 * 1024    # ~4 MiB VMEM-padded footprint per block buffer
_MAX_TILE_C = 2048                 # lane-block cap when rows are plentiful (mult. of 128)


def _round_up(x: int, m: int) -> int:
    return ((x + m - 1) // m) * m


def _cdiv(a: int, b: int) -> int:
    return (a + b - 1) // b


def _cparams(sem):
    return pltpu.CompilerParams(dimension_semantics=sem,
                                vmem_limit_bytes=_VMEM_LIMIT)


def _view2d(grad):
    """Free (no-copy) 2-D row-major view of the gradient."""
    if grad.ndim >= 2:
        return grad.reshape(grad.shape[0], -1)
    return grad.reshape(1, -1)


def _pick_tiles(rows: int, cols: int, itemsize: int):
    """Choose (tile_r, tile_c) targeting ~_BLOCK_TARGET of VMEM-padded bytes.

    Block dims are either a full array dim or (8,128)-divisible, so the
    BlockSpec constraint is always satisfied.
    """
    rows_vmem = _round_up(rows, 8)
    if rows_vmem * 128 * itemsize <= _BLOCK_TARGET:
        # Full rows fit even at minimum lane width -> expand along columns.
        tile_r = rows
        budget_c = _BLOCK_TARGET // (rows_vmem * itemsize)
        if _round_up(cols, 128) <= budget_c:
            tile_c = cols                                   # full dim
        else:
            tile_c = max(128, (budget_c // 128) * 128)      # 128-multiple
    else:
        tile_c = cols if cols <= _MAX_TILE_C else _MAX_TILE_C
        cols_vmem = _round_up(tile_c, 128)
        budget_r = max(8, _BLOCK_TARGET // (cols_vmem * itemsize))
        tile_r = rows if rows <= budget_r else max(8, (budget_r // 8) * 8)
    return tile_r, tile_c


def _pick_row_tile(rows: int, d: int, itemsize: int) -> int:
    """Row-block size for the per-row ("by atom") path; d stays unblocked."""
    # TODO(synk): for d larger than ~_VMEM_LIMIT/(4*128*8*itemsize) a second
    # (reduction) grid axis over d would be required; typical norm_dim is 3.
    d_vmem = _round_up(d, 128)
    budget_r = max(8, _BLOCK_TARGET // (d_vmem * itemsize))
    if rows <= budget_r:
        return rows
    return max(8, (budget_r // 8) * 8)


def _sanitize(g, bounds_dtype):
    """torch.nan_to_num(x, nan=0.0) computed in f32.

    NaN -> 0; +/-inf -> finite max/min of the *original* dtype (torch parity,
    also for bf16 inputs).
    """
    info = jnp.finfo(bounds_dtype)
    g32 = g.astype(jnp.float32)
    g32 = jnp.where(jnp.isnan(g32), jnp.float32(0.0), g32)
    return jnp.clip(g32, jnp.float32(info.min), jnp.float32(info.max))


# --------------------------------------------------------------------------
# Kernels
# --------------------------------------------------------------------------
def _value_clip_kernel(clip_ref, g_ref, out_ref, *, bounds_dtype):
    """norm_dim == 1 (clip by value): pure VPU clamp, no rsqrt, no overflow."""
    clip = clip_ref[0]
    g = _sanitize(g_ref[...], bounds_dtype)
    out_ref[...] = jnp.clip(g, -clip, clip).astype(out_ref.dtype)


def _row_clip_kernel(clip_ref, g_ref, out_ref, *, bounds_dtype):
    """norm_dim >= 2: per-row clipping on natural (tile_r, d) blocks."""
    clip = clip_ref[0]
    g = _sanitize(g_ref[...], bounds_dtype)                 # (tile_r, d) in f32
    sumsq = jnp.sum(g * g, axis=1, keepdims=True)           # (tile_r, 1)
    factor = jnp.minimum(clip * lax.rsqrt(sumsq), 1.0)      # rsqrt -> EUP slot
    out_ref[...] = (g * factor).astype(out_ref.dtype)


def _sumsq_kernel(g_ref, acc_ref, *, tile_r, tile_c, rows, cols,
                  mask_rows, mask_cols, cols_outer, bounds_dtype):
    """Pass 1 of norm_dim == -1: per-shard partial sum of squares.

    acc_ref is an (8,128) lane-dense accumulator block, resident across the
    inner grid axis; each entry holds partial/(8*128) so a plain sum over the
    whole partials array in the glue yields the exact total.
    """
    @pl.when(pl.program_id(1) == 0)
    def _():
        acc_ref[...] = jnp.zeros_like(acc_ref)

    g = _sanitize(g_ref[...], bounds_dtype)

    if mask_rows or mask_cols:
        if cols_outer:
            rb, cb = pl.program_id(1), pl.program_id(0)
        else:
            rb, cb = pl.program_id(0), pl.program_id(1)
        valid = None
        if mask_rows:
            rid = lax.broadcasted_iota(jnp.int32, g.shape, 0) + rb * tile_r
            valid = rid < rows
        if mask_cols:
            cid = lax.broadcasted_iota(jnp.int32, g.shape, 1) + cb * tile_c
            cv = cid < cols
            valid = cv if valid is None else (valid & cv)
        g = jnp.where(valid, g, jnp.float32(0.0))

    acc_ref[...] += jnp.sum(g * g) * (1.0 / (8.0 * 128.0))


def _scale_kernel(clip_ref, sumsq_ref, g_ref, out_ref, *, bounds_dtype):
    """Pass 2 of norm_dim == -1: factor computed in-kernel, uniform rescale."""
    factor = jnp.minimum(clip_ref[0] * lax.rsqrt(sumsq_ref[0]), 1.0)
    g = _sanitize(g_ref[...], bounds_dtype)
    out_ref[...] = (g * factor).astype(out_ref.dtype)


# --------------------------------------------------------------------------
# Wrappers (free views + pallas_call; no pad / transpose / slice)
# --------------------------------------------------------------------------
def _clip_by_value(grad, clip_arr):
    view = _view2d(grad)
    rows, cols = view.shape
    itemsize = jnp.dtype(grad.dtype).itemsize
    tile_r, tile_c = _pick_tiles(rows, cols, itemsize)
    grid = (_cdiv(rows, tile_r), _cdiv(cols, tile_c))

    out = pl.pallas_call(
        partial(_value_clip_kernel, bounds_dtype=grad.dtype),
        out_shape=jax.ShapeDtypeStruct(view.shape, grad.dtype),
        grid=grid,
        in_specs=[
            pl.BlockSpec(memory_space=pltpu.MemorySpace.SMEM),
            pl.BlockSpec((tile_r, tile_c), lambda i, j: (i, j)),
        ],
        out_specs=pl.BlockSpec((tile_r, tile_c), lambda i, j: (i, j)),
        input_output_aliases={1: 0},
        compiler_params=_cparams(("parallel", "parallel")),
    )(clip_arr, view)
    return out.reshape(grad.shape)


def _clip_by_row(grad, clip_arr, d):
    n = grad.size
    assert n % d == 0, "norm_dim must divide the number of elements"
    rows = n // d
    view = grad.reshape(rows, d)                      # free view
    itemsize = jnp.dtype(grad.dtype).itemsize
    tile_r = _pick_row_tile(rows, d, itemsize)
    grid = (_cdiv(rows, tile_r),)

    out = pl.pallas_call(
        partial(_row_clip_kernel, bounds_dtype=grad.dtype),
        out_shape=jax.ShapeDtypeStruct((rows, d), grad.dtype),
        grid=grid,
        in_specs=[
            pl.BlockSpec(memory_space=pltpu.MemorySpace.SMEM),
            pl.BlockSpec((tile_r, d), lambda i: (i, 0)),
        ],
        out_specs=pl.BlockSpec((tile_r, d), lambda i: (i, 0)),
        input_output_aliases={1: 0},
        compiler_params=_cparams(("parallel",)),
    )(clip_arr, view)
    return out.reshape(grad.shape)


def _clip_whole_tensor(grad, clip_arr):
    view = _view2d(grad)
    rows, cols = view.shape
    itemsize = jnp.dtype(grad.dtype).itemsize
    tile_r, tile_c = _pick_tiles(rows, cols, itemsize)
    nbr, nbc = _cdiv(rows, tile_r), _cdiv(cols, tile_c)

    # Put the axis with more blocks on the outer ("parallel") grid dim so
    # v7x can shard pass 1 across both TensorCores; the inner axis carries
    # the resident per-shard accumulator.
    cols_outer = nbc >= nbr
    if cols_outer:
        grid1 = (nbc, nbr)
        in_map1 = lambda c, r: (r, c)
        out_map1 = lambda c, r: (c, 0)
    else:
        grid1 = (nbr, nbc)
        in_map1 = lambda i, j: (i, j)
        out_map1 = lambda i, j: (i, 0)
    nshard = grid1[0]

    partials = pl.pallas_call(
        partial(_sumsq_kernel,
                tile_r=tile_r, tile_c=tile_c, rows=rows, cols=cols,
                mask_rows=(rows % tile_r != 0), mask_cols=(cols % tile_c != 0),
                cols_outer=cols_outer, bounds_dtype=grad.dtype),
        out_shape=jax.ShapeDtypeStruct((nshard * 8, 128), jnp.float32),
        grid=grid1,
        in_specs=[pl.BlockSpec((tile_r, tile_c), in_map1)],
        out_specs=pl.BlockSpec((8, 128), out_map1),
        compiler_params=_cparams(("parallel", "arbitrary")),
    )(view)

    # Tiny scalar glue: partials already carry the 1/(8*128) factor, so a
    # plain sum gives the exact global sum of squares.
    sumsq = jnp.sum(partials).reshape(1)

    out = pl.pallas_call(
        partial(_scale_kernel, bounds_dtype=grad.dtype),
        out_shape=jax.ShapeDtypeStruct(view.shape, grad.dtype),
        grid=(nbr, nbc),
        in_specs=[
            pl.BlockSpec(memory_space=pltpu.MemorySpace.SMEM),
            pl.BlockSpec(memory_space=pltpu.MemorySpace.SMEM),
            pl.BlockSpec((tile_r, tile_c), lambda i, j: (i, j)),
        ],
        out_specs=pl.BlockSpec((tile_r, tile_c), lambda i, j: (i, j)),
        input_output_aliases={2: 0},
        compiler_params=_cparams(("parallel", "parallel")),
    )(clip_arr, sumsq, view)
    return out.reshape(grad.shape)


@partial(jax.jit, static_argnames=("norm_dim",))
def clip_tensor_pallas(grad, clip, norm_dim):
    """Equivalent of ClipGradient.clip_tensor, computed in Pallas TPU kernels."""
    clip_arr = jnp.asarray(clip, dtype=jnp.float32).reshape(1)
    if norm_dim == -1:
        return _clip_whole_tensor(grad, clip_arr)
    if norm_dim == 1:
        return _clip_by_value(grad, clip_arr)
    return _clip_by_row(grad, clip_arr, norm_dim)


# --------------------------------------------------------------------------
# Module
# --------------------------------------------------------------------------
class ClipGradient:
    """JAX/Pallas port of bgflow's ClipGradient.

    clip     : max norm (scalar)
    norm_dim : 1 -> clip by value, 3 -> clip by atom, -1 -> clip whole-tensor norm
    Forward is the identity; clipping runs on the cotangent in the backward pass.
    """

    def __init__(self, clip, norm_dim: int = 1):
        self.clip = jnp.asarray(clip, dtype=jnp.float32)
        self.norm_dim = int(norm_dim)

        # TODO(synk): torch's per-tensor `requires_grad` check has no JAX
        # equivalent; the backward hook is applied to every input instead.
        @jax.custom_vjp
        def _identity(x):
            return x

        def _fwd(x):
            return x, None

        def _bwd(_, g):
            return (clip_tensor_pallas(g, self.clip, norm_dim=self.norm_dim),)

        _identity.defvjp(_fwd, _bwd)
        self._f = _identity

    def __call__(self, *xs):
        outs = tuple(self._f(x) for x in xs)
        return outs[0] if len(outs) == 1 else outs  # unpack_tensor_tuple semantics


def _reference_clip(grad, clip, norm_dim):
    """Pure-JAX reference (mirrors the PyTorch clip_tensor)."""
    orig = grad.shape
    slab = grad.reshape(1, -1) if norm_dim == -1 else grad.reshape(-1, norm_dim)
    slab = jnp.nan_to_num(slab, nan=0.0)
    norm = jnp.linalg.norm(slab.astype(jnp.float32), axis=-1, keepdims=True)
    factor = jnp.minimum(clip / norm, 1.0)
    return (slab * factor).reshape(orig).astype(grad.dtype)


if __name__ == "__main__":
    key = jax.random.PRNGKey(0)
    kx, kw, km, kr = jax.random.split(key, 4)

    # --- Small demo: "clip by atom" on (batch=2, atoms=32, dims=3) ------------
    x = jax.random.normal(kx, (2, 32, 3), dtype=jnp.float32)
    cot = 10.0 * jax.random.normal(kw, (2, 32, 3), dtype=jnp.float32)
    cot = cot.at[0, 0, 0].set(jnp.nan)      # exercise the nan_to_num path

    module = ClipGradient(clip=0.5, norm_dim=3)

    # Forward: identity
    y = jax.block_until_ready(module(x))
    assert jnp.allclose(y, x), "forward is not the identity"

    # Backward: Pallas per-row ("by atom") clipping of the incoming cotangent
    loss = lambda x_: jnp.sum(module(x_) * cot)
    g = jax.block_until_ready(jax.grad(loss)(x))
    ref = _reference_clip(cot, 0.5, 3)
    assert jnp.allclose(g, ref, atol=1e-5, rtol=1e-3), "norm_dim=3 mismatch"

    # Whole-tensor clipping (norm_dim=-1) and clip-by-value (norm_dim=1)
    g_whole = jax.block_until_ready(clip_tensor_pallas(cot, 0.5, norm_dim=-1))
    assert jnp.allclose(g_whole, _reference_clip(cot, 0.5, -1),
                        atol=1e-5, rtol=1e-3), "norm_dim=-1 mismatch"
    g_val = jax.block_until_ready(clip_tensor_pallas(cot, 0.5, norm_dim=1))
    assert jnp.allclose(g_val, _reference_clip(cot, 0.5, 1),
                        atol=1e-5, rtol=1e-3), "norm_dim=1 mismatch"

    # --- Multi-block checks (exercise boundary-block masking / accumulation) --
    gm = 3.0 * jax.random.normal(km, (6, 131075), dtype=jnp.float32)
    out_m = jax.block_until_ready(clip_tensor_pallas(gm, 0.5, norm_dim=-1))
    assert jnp.allclose(out_m, _reference_clip(gm, 0.5, -1),
                        atol=1e-5, rtol=1e-3), "multi-block norm_dim=-1 mismatch"
    out_mv = jax.block_until_ready(clip_tensor_pallas(gm, 0.5, norm_dim=1))
    assert jnp.allclose(out_mv, _reference_clip(gm, 0.5, 1),
                        atol=1e-5, rtol=1e-3), "multi-block norm_dim=1 mismatch"

    gr = 2.0 * jax.random.normal(kr, (20000, 3), dtype=jnp.float32)
    out_r = jax.block_until_ready(clip_tensor_pallas(gr, 0.5, norm_dim=3))
    assert jnp.allclose(out_r, _reference_clip(gr, 0.5, 3),
                        atol=1e-5, rtol=1e-3), "multi-block norm_dim=3 mismatch"

    print("KERNEL_OK")
</pallas_src>

<mosaic_0001>
module attributes {stable_mosaic.version = 11 : i64} {
  func.func @_row_clip_kernel(%arg0: i32, %arg1: memref<1xf32, #tpu.memory_space<smem>>, %arg2: memref<64x3xf32, #tpu.memory_space<vmem>>, %arg3: memref<64x3xf32, #tpu.memory_space<vmem>>) attributes {dimension_semantics = [#tpu.dimension_semantics<parallel>], iteration_bounds = array<i64: 1>, scalar_prefetch = 0 : i64, scratch_operands = 0 : i64, tpu.core_type = #tpu.core_type<tc>, window_params = [{transform_indices = @transform_0, window_bounds = array<i64: 1>}, {transform_indices = @transform_1, window_bounds = array<i64: 64, 3>}, {transform_indices = @transform_2, window_bounds = array<i64: 64, 3>}]} {
    %c0 = arith.constant 0 : index
    %0 = memref.load %arg1[%c0] : memref<1xf32, #tpu.memory_space<smem>>
    %c0_0 = arith.constant 0 : index
    %c0_1 = arith.constant 0 : index
    %1 = vector.load %arg2[%c0_0, %c0_1] : memref<64x3xf32, #tpu.memory_space<vmem>>, vector<64x3xf32>
    %2 = arith.cmpf one, %1, %1 : vector<64x3xf32>
    %cst = arith.constant 0.000000e+00 : f32
    %3 = vector.broadcast %cst : f32 to vector<64x3xf32>
    %4 = arith.select %2, %3, %1 : vector<64x3xi1>, vector<64x3xf32>
    %cst_2 = arith.constant -3.40282347E+38 : f32
    %cst_3 = arith.constant 3.40282347E+38 : f32
    %5 = vector.broadcast %cst_2 : f32 to vector<64x3xf32>
    %6 = arith.maximumf %5, %4 : vector<64x3xf32>
    %7 = vector.broadcast %cst_3 : f32 to vector<64x3xf32>
    %8 = arith.minimumf %7, %6 : vector<64x3xf32>
    %9 = arith.mulf %8, %8 : vector<64x3xf32>
    %cst_4 = arith.constant dense<0.000000e+00> : vector<64xf32>
    %10 = vector.multi_reduction <add>, %9, %cst_4 [1] : vector<64x3xf32> to vector<64xf32>
    %11 = vector.shape_cast %10 : vector<64xf32> to vector<64x1xf32>
    %12 = math.rsqrt %11 : vector<64x1xf32>
    %13 = vector.broadcast %0 : f32 to vector<64x1xf32>
    %14 = arith.mulf %13, %12 : vector<64x1xf32>
    %cst_5 = arith.constant 1.000000e+00 : f32
    %15 = vector.broadcast %cst_5 : f32 to vector<64x1xf32>
    %16 = arith.minimumf %14, %15 : vector<64x1xf32>
    %17 = vector.broadcast %16 : vector<64x1xf32> to vector<64x3xf32>
    %18 = arith.mulf %8, %17 : vector<64x3xf32>
    %c0_6 = arith.constant 0 : index
    %c0_7 = arith.constant 0 : index
    %19 = vector.load %arg3[%c0_6, %c0_7] : memref<64x3xf32, #tpu.memory_space<vmem>>, vector<64x3xf32>
    tpu.vector_store %arg3[%c0_6, %c0_7], %18 {strides = array<i32>} : memref<64x3xf32, #tpu.memory_space<vmem>>, vector<64x3xf32>,
    return
  }
  func.func @transform_0(%arg0: i32) -> i32 {
    %c0_i32 = arith.constant 0 : i32
    %c0_i32_0 = arith.constant 0 : i32
    return %c0_i32 : i32
  }
  func.func @transform_1(%arg0: i32) -> (i32, i32) {
    %c0_i32 = arith.constant 0 : i32
    %c0_i32_0 = arith.constant 0 : i32
    return %arg0, %c0_i32 : i32, i32
  }
  func.func @transform_2(%arg0: i32) -> (i32, i32) {
    %c0_i32 = arith.constant 0 : i32
    %c0_i32_0 = arith.constant 0 : i32
    return %arg0, %c0_i32 : i32, i32
  }
}

</mosaic_0001>

<bundles_post_ra>
// kernel: clip_tensor_pallas.1
= control target key start
LH: loop header
LB: loop body
LE: loop exit
PB: predicated region body
PF: predicated region fallthrough
CT: control target
= control target key end

     0   :  { %vm61_vm1 = vcmask 23552   ;;  %s277_s1 = inlined_call_operand.vmem [shape: f32[64,3], index: 1, kind: input, shape index: {}, may-alias: {1,2}]   ;;  %s278_s0 = inlined_call_operand.<no memory space> [shape: f32[1], index: 0, kind: input, shape index: {}]   ;;  %s279_s2 = inlined_call_operand.vmem [shape: f32[64,3], index: 2, kind: output, shape index: {}, may-alias: {1,2}]  }
   0x1   :  { %v15_v0 = vld [vmem:[%s277_s1 + $0x10] sm:$0xff]  ;;  %v13_v1 = vld [vmem:[%s277_s1] sm:$0xff]  ;;  %v16_v2 = vld [vmem:[%s277_s1 + $0x18] sm:$0xff]  ;;  %v94_v46 = vstv %s278_s0 }
   0x2   :  { %vm23_vm0 = vcmp.ne.f32.partialorder %v15_v0, %v15_v0  ;;  %vm21_vm2 = vcmp.ne.f32.partialorder %v13_v1, %v13_v1  ;;  %vm24_vm3 = vcmp.ne.f32.partialorder %v16_v2, %v16_v2  ;;  %v14_v3 = vld [vmem:[%s277_s1 + $0x8] sm:$0xff]  ;;  %v17_v5 = vld [vmem:[%s277_s1 + $0x20] sm:$0xff]  ;;  %v20_v9 = vld [vmem:[%s277_s1 + $0x38] sm:$0xff] }
   0x3   :  { %v18_v4 = vld [vmem:[%s277_s1 + $0x28] sm:$0xff]  ;;  %v31_v6 = vsel %vm23_vm0, 0.0, %v15_v0  ;;  %v29_v7 = vsel %vm21_vm2, 0.0, %v13_v1  ;;  %v32_v8 = vsel %vm24_vm3, 0.0, %v16_v2  ;;  %vm22_vm4 = vcmp.ne.f32.partialorder %v14_v3, %v14_v3  ;;  %v19_v10 = vld [vmem:[%s277_s1 + $0x30] sm:$0xff] }
   0x4   :  { %v194_v11 = vclamps-f32 %v31_v6, 3.4028235e+38  ;;  %v196_v12 = vclamps-f32 %v29_v7, 3.4028235e+38  ;;  %v198_v13 = vclamps-f32 %v32_v8, 3.4028235e+38  ;;  %vm26_vm5 = vcmp.ne.f32.partialorder %v18_v4, %v18_v4 }
   0x5   :  { %v30_v14 = vsel %vm22_vm4, 0.0, %v14_v3  ;;  %v34_v15 = vsel %vm26_vm5, 0.0, %v18_v4  ;;  %vm25_vm6 = vcmp.ne.f32.partialorder %v17_v5, %v17_v5  ;;  %vm28_vm7 = vcmp.ne.f32.partialorder %v20_v9, %v20_v9 }
   0x6   :  { %v55_v16 = vmul.f32 %v194_v11, %v194_v11  ;;  %v53_v17 = vmul.f32 %v196_v12, %v196_v12  ;;  %v56_v18 = vmul.f32 %v198_v13, %v198_v13  ;;  %v206_v19 = vclamps-f32 %v30_v14, 3.4028235e+38 }
   0x7   :  { %v208_v20 = vclamps-f32 %v34_v15, 3.4028235e+38  ;;  %v33_v21 = vsel %vm25_vm6, 0.0, %v17_v5  ;;  %v36_v22 = vsel %vm28_vm7, 0.0, %v20_v9  ;;  %vm27_vm8 = vcmp.ne.f32.partialorder %v19_v10, %v19_v10 }
   0x8   :  { %v68_v23 = vsel %vm61_vm1, %v55_v16, 0.0  ;;  %v62_v24 = vsel %vm61_vm1, %v53_v17, 0.0  ;;  %v54_v25 = vmul.f32 %v206_v19, %v206_v19  ;;  %v71_v26 = vsel %vm61_vm1, %v56_v18, 0.0 }
   0x9   :  { %69 = vadd.xlane.f32.xlu1 %v68_v23  ;;  %63 = vadd.xlane.f32.xlu0 %v62_v24  ;;  %v215_v27 = vclamps-f32 %v33_v21, 3.4028235e+38  ;;  %v35_v28 = vsel %vm27_vm8, 0.0, %v19_v10  ;;  %v58_v30 = vmul.f32 %v208_v20, %v208_v20  ;;  %v220_v31 = vclamps-f32 %v36_v22, 3.4028235e+38 }
   0xa   :  { %v65_v29 = vsel %vm61_vm1, %v54_v25, 0.0  ;;  %v222_v32 = vclamps-f32 %v35_v28, 3.4028235e+38 }
   0xb   :  { %v57_v33 = vmul.f32 %v215_v27, %v215_v27  ;;  %v77_v34 = vsel %vm61_vm1, %v58_v30, 0.0  ;;  %v60_v36 = vmul.f32 %v220_v31, %v220_v31 }
   0xc   :  { %v59_v37 = vmul.f32 %v222_v32, %v222_v32 }
   0xd   :  { %72 = vadd.xlane.f32.xlu1 %v71_v26  ;;  %66 = vadd.xlane.f32.xlu0 %v65_v29  ;;  %v74_v35 = vsel %vm61_vm1, %v57_v33, 0.0  ;;  %v83_v38 = vsel %vm61_vm1, %v60_v36, 0.0 }
   0xe   :  { %v80_v39 = vsel %vm61_vm1, %v59_v37, 0.0 }
  0x11   :  { %78 = vadd.xlane.f32.xlu1 %v77_v34  ;;  %75 = vadd.xlane.f32.xlu0 %v74_v35 }
  0x15   :  { %84 = vadd.xlane.f32.xlu1 %v83_v38  ;;  %81 = vadd.xlane.f32.xlu0 %v80_v39 }
  0x92   :  { %v70_v40 = vpop.xlane.xlu1 %69  ;;  %v64_v41 = vpop.xlane.xlu0 %63 }
  0x93   :  { %139 = vrsqrt.f32 %v70_v40 }
  0x94   :  { %141 = vrsqrt.f32 %v64_v41 }
  0x96   :  { %v73_v42 = vpop.xlane.xlu1 %72  ;;  %v67_v43 = vpop.xlane.xlu0 %66 }
  0x97   :  { %143 = vrsqrt.f32 %v73_v42 }
  0x98   :  { %145 = vrsqrt.f32 %v67_v43 }
  0x9a   :  { %v79_v44 = vpop.xlane.xlu1 %78  ;;  %v76_v45 = vpop.xlane.xlu0 %75 }
  0x9b   :  { %147 = vrsqrt.f32 %v79_v44 }
  0x9c   :  { %149 = vrsqrt.f32 %v76_v45 }
  0x9e   :  { %v85_v47 = vpop.xlane.xlu1 %84  ;;  %v82_v48 = vpop.xlane.xlu0 %81 }
  0x9f   :  { %151 = vrsqrt.f32 %v85_v47 }
  0xa0   :  { %v140_v49 = vpop.eup %139  ;;  %153 = vrsqrt.f32 %v82_v48 }
  0xa1   :  { %v142_v50 = vpop.eup %141  ;;  %v97_v51 = vmul.f32 %v140_v49, %v94_v46 }
  0xa2   :  { %v95_v52 = vmul.f32 %v142_v50, %v94_v46 }
  0xa3   :  { %v105_v53 = vmin.f32 %v97_v51, 1.0 }
  0xa4   :  { %v144_v54 = vpop.eup %143  ;;  %v103_v55 = vmin.f32 %v95_v52, 1.0 }
  0xa5   :  { %v146_v56 = vpop.eup %145  ;;  %v113_v57 = vmul.f32 %v194_v11, %v105_v53  ;;  %v98_v58 = vmul.f32 %v144_v54, %v94_v46 }
  0xa6   :  { %v111_v59 = vmul.f32 %v196_v12, %v103_v55  ;;  %v96_v60 = vmul.f32 %v146_v56, %v94_v46 }
  0xa7   :  { %121 = vst.msk [vmem:[%s279_s2 + $0x10] sm:$0xff] %vm61_vm1, %v113_v57  ;;  %v106_v61 = vmin.f32 %v98_v58, 1.0 }
  0xa8   :  { %v148_v62 = vpop.eup %147  ;;  %119 = vst.msk [vmem:[%s279_s2] sm:$0xff] %vm61_vm1, %v111_v59  ;;  %v104_v63 = vmin.f32 %v96_v60, 1.0 }
  0xa9   :  { %v150_v0 = vpop.eup %149  ;;  %v114_v1 = vmul.f32 %v198_v13, %v106_v61  ;;  %v100_v2 = vmul.f32 %v148_v62, %v94_v46 }
  0xaa   :  { %v112_v3 = vmul.f32 %v206_v19, %v104_v63  ;;  %v99_v4 = vmul.f32 %v150_v0, %v94_v46 }
  0xab   :  { %122 = vst.msk [vmem:[%s279_s2 + $0x18] sm:$0xff] %vm61_vm1, %v114_v1  ;;  %v108_v5 = vmin.f32 %v100_v2, 1.0 }
  0xac   :  { %v152_v6 = vpop.eup %151  ;;  %120 = vst.msk [vmem:[%s279_s2 + $0x8] sm:$0xff] %vm61_vm1, %v112_v3  ;;  %v107_v7 = vmin.f32 %v99_v4, 1.0 }
  0xad   :  { %v154_v8 = vpop.eup %153  ;;  %v116_v9 = vmul.f32 %v208_v20, %v108_v5  ;;  %v102_v10 = vmul.f32 %v152_v6, %v94_v46 }
  0xae   :  { %v115_v11 = vmul.f32 %v215_v27, %v107_v7  ;;  %v101_v12 = vmul.f32 %v154_v8, %v94_v46 }
  0xaf   :  { %124 = vst.msk [vmem:[%s279_s2 + $0x28] sm:$0xff] %vm61_vm1, %v116_v9  ;;  %v110_v13 = vmin.f32 %v102_v10, 1.0 }
  0xb0   :  { %123 = vst.msk [vmem:[%s279_s2 + $0x20] sm:$0xff] %vm61_vm1, %v115_v11  ;;  %v109_v14 = vmin.f32 %v101_v12, 1.0 }
  0xb1   :  { %v118_v15 = vmul.f32 %v220_v31, %v110_v13 }
  0xb2   :  { %v117_v16 = vmul.f32 %v222_v32, %v109_v14 }
  0xb3   :  { %126 = vst.msk [vmem:[%s279_s2 + $0x38] sm:$0xff] %vm61_vm1, %v118_v15 }
  0xb4   :  { %125 = vst.msk [vmem:[%s279_s2 + $0x30] sm:$0xff] %vm61_vm1, %v117_v16 }

</bundles_post_ra>
